<compile_context>
chip_gen: v5e
topology: v5e:2x2
jax: 0.10.0
libtpu: 0.0.40
codegen_flags: <defaults>
</compile_context>

<pallas_src>
import functools

import jax
import jax.numpy as jnp
from jax.experimental import pallas as pl
from jax.experimental.pallas import tpu as pltpu

LANE = 128     # TPU lane width: output last dims kept multiples of this
SUBLANE = 8    # TPU sublane width: batch tiles kept multiples of this


def _round_up(x, m):
    return (x + m - 1) // m * m


def _mlp_compute(x_ref, w1_ref, b1_ref, w2_ref, b2_ref, out_ref, feat_ref):
    # Compute dtype (bf16 by default) feeds the MXU; accumulate in f32.
    cdt = w1_ref.dtype
    x = x_ref[...].astype(cdt)
    h = jnp.dot(x, w1_ref[...], preferred_element_type=jnp.float32)
    h = jnp.maximum(h + b1_ref[...], 0.0)          # bias-add / ReLU in f32 (VPU)
    if feat_ref is not None:
        # Features are the un-rounded f32 hidden activations (== intial_out);
        # the classifier matmul consumes their bf16-rounded copy below.
        feat_ref[...] = h.astype(feat_ref.dtype)
    o = jnp.dot(h.astype(cdt), w2_ref[...], preferred_element_type=jnp.float32)
    out_ref[...] = (o + b2_ref[...]).astype(out_ref.dtype)


def _mlp_kernel(x_ref, w1_ref, b1_ref, w2_ref, b2_ref, out_ref):
    _mlp_compute(x_ref, w1_ref, b1_ref, w2_ref, b2_ref, out_ref, None)


def _mlp_kernel_with_features(x_ref, w1_ref, b1_ref, w2_ref, b2_ref,
                              out_ref, feat_ref):
    _mlp_compute(x_ref, w1_ref, b1_ref, w2_ref, b2_ref, out_ref, feat_ref)


@functools.partial(
    jax.jit, static_argnames=("return_features", "block_b", "compute_dtype"))
def mlp_forward(x, w1, b1, w2, b2, return_features=False, block_b=512,
                compute_dtype=jnp.bfloat16):
    """Fused MLP forward matching mlpModel.forward.

    x:  (B, F) float32
    w1: (F, H) float32   (PyTorch intial_layer Linear weight, transposed)
    b1: (1, H) float32
    w2: (H, C) float32   (PyTorch classifier_layer Linear weight, transposed)
    b2: (1, C) float32
    """
    B, F = x.shape
    H = w1.shape[1]
    C = w2.shape[1]

    # ---- lane-dense padding of hidden / class dims (full 128-wide stores) ----
    Hp = _round_up(H, LANE)
    Cp = _round_up(C, LANE)
    if Hp != H:
        w1 = jnp.pad(w1, ((0, 0), (0, Hp - H)))
        b1 = jnp.pad(b1, ((0, 0), (0, Hp - H)))
        w2 = jnp.pad(w2, ((0, Hp - H), (0, 0)))
    if Cp != C:
        w2 = jnp.pad(w2, ((0, 0), (0, Cp - C)))
        b2 = jnp.pad(b2, ((0, 0), (0, Cp - C)))

    # Cast weights once to the MXU compute dtype; biases stay f32.
    w1 = w1.astype(compute_dtype)
    w2 = w2.astype(compute_dtype)
    b1 = b1.astype(jnp.float32)
    b2 = b2.astype(jnp.float32)

    # ---- batch tile: as big as fits, multiple of 8 sublanes ----
    bb = min(block_b, B)
    if bb < B:
        bb = max(SUBLANE, (bb // SUBLANE) * SUBLANE)
    grid = (pl.cdiv(B, bb),)

    # Grid-invariant operands: whole array resident in VMEM, no double-buffering.
    # NOTE: for very large F/H (e.g. F*H*2 bytes approaching the 64 MiB VMEM of
    # v7x) switch to a tiled contraction axis ("arbitrary") with an f32
    # accumulator scratch instead of weight residency, and raise
    # vmem_limit_bytes accordingly.
    resident = pl.BlockSpec(memory_space=pltpu.MemorySpace.VMEM)
    in_specs = [
        pl.BlockSpec((bb, F), lambda i: (i, 0)),   # x tile (pipelined over batch)
        resident,                                  # W1
        resident,                                  # b1
        resident,                                  # W2
        resident,                                  # b2
    ]

    out_dtype = x.dtype
    if return_features:
        kernel = _mlp_kernel_with_features
        out_shape = (
            jax.ShapeDtypeStruct((B, Cp), out_dtype),
            jax.ShapeDtypeStruct((B, Hp), out_dtype),
        )
        out_specs = (
            pl.BlockSpec((bb, Cp), lambda i: (i, 0)),
            pl.BlockSpec((bb, Hp), lambda i: (i, 0)),
        )
    else:
        kernel = _mlp_kernel
        out_shape = jax.ShapeDtypeStruct((B, Cp), out_dtype)
        out_specs = pl.BlockSpec((bb, Cp), lambda i: (i, 0))

    result = pl.pallas_call(
        kernel,
        grid=grid,
        in_specs=in_specs,
        out_specs=out_specs,
        out_shape=out_shape,
        compiler_params=pltpu.CompilerParams(
            dimension_semantics=("parallel",),
        ),
    )(x, w1, b1, w2, b2)

    if return_features:
        logits, feats = result
        return logits[:, :C], feats[:, :H]
    return result[:, :C]


def init_mlp_params(key, input_features, num_classes, net_size):
    """Deterministic init matching PyTorch nn.Linear default (uniform +/- 1/sqrt(fan_in))."""
    k1, k2, k3, k4 = jax.random.split(key, 4)
    bound1 = 1.0 / jnp.sqrt(jnp.float32(input_features))
    bound2 = 1.0 / jnp.sqrt(jnp.float32(net_size))
    w1 = jax.random.uniform(k1, (input_features, net_size), jnp.float32, -bound1, bound1)
    b1 = jax.random.uniform(k2, (1, net_size), jnp.float32, -bound1, bound1)
    w2 = jax.random.uniform(k3, (net_size, num_classes), jnp.float32, -bound2, bound2)
    b2 = jax.random.uniform(k4, (1, num_classes), jnp.float32, -bound2, bound2)
    return w1, b1, w2, b2


if __name__ == "__main__":
    # Small shapes consistent with mlpModel(input_features, num_classes, net_size)
    batch = 8
    input_features = 16
    net_size = 32
    num_classes = 4

    key = jax.random.PRNGKey(0)
    kx, kp = jax.random.split(key)
    x = jax.random.normal(kx, (batch, input_features), jnp.float32)
    w1, b1, w2, b2 = init_mlp_params(kp, input_features, num_classes, net_size)

    logits, feats = mlp_forward(x, w1, b1, w2, b2, return_features=True)
    logits_only = mlp_forward(x, w1, b1, w2, b2, return_features=False)
    jax.block_until_ready((logits, feats, logits_only))

    # Pure-JAX reference with the same bf16-matmul / f32-accumulate recipe.
    cdt = jnp.bfloat16
    h_ref = jnp.maximum(
        jnp.dot(x.astype(cdt), w1.astype(cdt),
                preferred_element_type=jnp.float32) + b1, 0.0)
    out_ref = jnp.dot(h_ref.astype(cdt), w2.astype(cdt),
                      preferred_element_type=jnp.float32) + b2

    assert logits.shape == (batch, num_classes)
    assert feats.shape == (batch, net_size)
    assert jnp.allclose(logits, out_ref, atol=5e-3, rtol=5e-3)
    assert jnp.allclose(feats, h_ref, atol=5e-3, rtol=5e-3)
    assert jnp.allclose(logits_only, logits, atol=1e-6, rtol=1e-6)

    print("KERNEL_OK")
</pallas_src>

<mosaic_0001>
module attributes {stable_mosaic.version = 11 : i64} {
  func.func @_mlp_kernel_with_features(%arg0: i32, %arg1: memref<8x16xf32, #tpu.memory_space<vmem>>, %arg2: memref<16x128xbf16, #tpu.memory_space<vmem>>, %arg3: memref<1x128xf32, #tpu.memory_space<vmem>>, %arg4: memref<128x128xbf16, #tpu.memory_space<vmem>>, %arg5: memref<1x128xf32, #tpu.memory_space<vmem>>, %arg6: memref<8x128xf32, #tpu.memory_space<vmem>>, %arg7: memref<8x128xf32, #tpu.memory_space<vmem>>) attributes {dimension_semantics = [#tpu.dimension_semantics<parallel>], iteration_bounds = array<i64: 1>, scalar_prefetch = 0 : i64, scratch_operands = 0 : i64, tpu.core_type = #tpu.core_type<tc>, window_params = [{transform_indices = @transform_0, window_bounds = array<i64: 8, 16>}, {pipeline_mode = #tpu.pipeline_mode<synchronous>, transform_indices = @transform_1, window_bounds = array<i64: 16, 128>}, {pipeline_mode = #tpu.pipeline_mode<synchronous>, transform_indices = @transform_2, window_bounds = array<i64: 1, 128>}, {pipeline_mode = #tpu.pipeline_mode<synchronous>, transform_indices = @transform_3, window_bounds = array<i64: 128, 128>}, {pipeline_mode = #tpu.pipeline_mode<synchronous>, transform_indices = @transform_4, window_bounds = array<i64: 1, 128>}, {transform_indices = @transform_5, window_bounds = array<i64: 8, 128>}, {transform_indices = @transform_6, window_bounds = array<i64: 8, 128>}]} {
    %c0 = arith.constant 0 : index
    %c0_0 = arith.constant 0 : index
    %0 = vector.load %arg1[%c0, %c0_0] : memref<8x16xf32, #tpu.memory_space<vmem>>, vector<8x16xf32>
    %1 = arith.truncf %0 : vector<8x16xf32> to vector<8x16xbf16>
    %c0_1 = arith.constant 0 : index
    %c0_2 = arith.constant 0 : index
    %2 = vector.load %arg2[%c0_1, %c0_2] : memref<16x128xbf16, #tpu.memory_space<vmem>>, vector<16x128xbf16>
    %cst = arith.constant dense<0.000000e+00> : vector<8x128xf32>
    %3 = tpu.matmul %1, %2, %cst {dimension_numbers = #tpu.dot_dimension_numbers<[1], [0], [0], [1], [0, 0, 1, 1], [], []>} : vector<8x16xbf16>, vector<16x128xbf16>, vector<8x128xf32> -> vector<8x128xf32>
    %c0_3 = arith.constant 0 : index
    %c0_4 = arith.constant 0 : index
    %4 = vector.load %arg3[%c0_3, %c0_4] : memref<1x128xf32, #tpu.memory_space<vmem>>, vector<1x128xf32>
    %5 = vector.broadcast %4 : vector<1x128xf32> to vector<8x128xf32>
    %6 = arith.addf %3, %5 : vector<8x128xf32>
    %cst_5 = arith.constant 0.000000e+00 : f32
    %7 = vector.broadcast %cst_5 : f32 to vector<8x128xf32>
    %8 = arith.maximumf %6, %7 : vector<8x128xf32>
    %c0_6 = arith.constant 0 : index
    %c0_7 = arith.constant 0 : index
    %9 = vector.load %arg7[%c0_6, %c0_7] : memref<8x128xf32, #tpu.memory_space<vmem>>, vector<8x128xf32>
    tpu.vector_store %arg7[%c0_6, %c0_7], %8 {strides = array<i32>} : memref<8x128xf32, #tpu.memory_space<vmem>>, vector<8x128xf32>,
    %10 = arith.truncf %8 : vector<8x128xf32> to vector<8x128xbf16>
    %c0_8 = arith.constant 0 : index
    %c0_9 = arith.constant 0 : index
    %11 = vector.load %arg4[%c0_8, %c0_9] : memref<128x128xbf16, #tpu.memory_space<vmem>>, vector<128x128xbf16>
    %cst_10 = arith.constant dense<0.000000e+00> : vector<8x128xf32>
    %12 = tpu.matmul %10, %11, %cst_10 {dimension_numbers = #tpu.dot_dimension_numbers<[1], [0], [0], [1], [0, 0, 1, 1], [], []>} : vector<8x128xbf16>, vector<128x128xbf16>, vector<8x128xf32> -> vector<8x128xf32>
    %c0_11 = arith.constant 0 : index
    %c0_12 = arith.constant 0 : index
    %13 = vector.load %arg5[%c0_11, %c0_12] : memref<1x128xf32, #tpu.memory_space<vmem>>, vector<1x128xf32>
    %14 = vector.broadcast %13 : vector<1x128xf32> to vector<8x128xf32>
    %15 = arith.addf %12, %14 : vector<8x128xf32>
    %c0_13 = arith.constant 0 : index
    %c0_14 = arith.constant 0 : index
    %16 = vector.load %arg6[%c0_13, %c0_14] : memref<8x128xf32, #tpu.memory_space<vmem>>, vector<8x128xf32>
    tpu.vector_store %arg6[%c0_13, %c0_14], %15 {strides = array<i32>} : memref<8x128xf32, #tpu.memory_space<vmem>>, vector<8x128xf32>,
    return
  }
  func.func @transform_0(%arg0: i32) -> (i32, i32) {
    %c0_i32 = arith.constant 0 : i32
    %c0_i32_0 = arith.constant 0 : i32
    return %arg0, %c0_i32 : i32, i32
  }
  func.func @transform_1(%arg0: i32) -> (i32, i32) {
    %c0_i32 = arith.constant 0 : i32
    %c0_i32_0 = arith.constant 0 : i32
    %c0_i32_1 = arith.constant 0 : i32
    return %c0_i32, %c0_i32_0 : i32, i32
  }
  func.func @transform_2(%arg0: i32) -> (i32, i32) {
    %c0_i32 = arith.constant 0 : i32
    %c0_i32_0 = arith.constant 0 : i32
    %c0_i32_1 = arith.constant 0 : i32
    return %c0_i32, %c0_i32_0 : i32, i32
  }
  func.func @transform_3(%arg0: i32) -> (i32, i32) {
    %c0_i32 = arith.constant 0 : i32
    %c0_i32_0 = arith.constant 0 : i32
    %c0_i32_1 = arith.constant 0 : i32
    return %c0_i32, %c0_i32_0 : i32, i32
  }
  func.func @transform_4(%arg0: i32) -> (i32, i32) {
    %c0_i32 = arith.constant 0 : i32
    %c0_i32_0 = arith.constant 0 : i32
    %c0_i32_1 = arith.constant 0 : i32
    return %c0_i32, %c0_i32_0 : i32, i32
  }
  func.func @transform_5(%arg0: i32) -> (i32, i32) {
    %c0_i32 = arith.constant 0 : i32
    %c0_i32_0 = arith.constant 0 : i32
    return %arg0, %c0_i32 : i32, i32
  }
  func.func @transform_6(%arg0: i32) -> (i32, i32) {
    %c0_i32 = arith.constant 0 : i32
    %c0_i32_0 = arith.constant 0 : i32
    return %arg0, %c0_i32 : i32, i32
  }
}

</mosaic_0001>

<bundles_post_ra>
// kernel: mlp_forward.1
= control target key start
LH: loop header
LB: loop body
LE: loop exit
PB: predicated region body
PF: predicated region fallthrough
CT: control target
= control target key end

     0   :  { %vm38_vm0 = vcmask 130048   ;;  %s313_s0 = inlined_call_operand.vmem [shape: f32[8,16], index: 0, kind: input, shape index: {}]   ;;  %s314_s1 = inlined_call_operand.vmem [shape: bf16[16,128], index: 1, kind: input, shape index: {}]   ;;  %s315_s2 = inlined_call_operand.vmem [shape: f32[1,128], index: 2, kind: input, shape index: {}]   ;;  %s316_s3 = inlined_call_operand.vmem [shape: bf16[128,128], index: 3, kind: input, shape index: {}]   ;;  %s317_s4 = inlined_call_operand.vmem [shape: f32[1,128], index: 4, kind: input, shape index: {}]   ;;  %s318_s5 = inlined_call_operand.vmem [shape: f32[8,128], index: 5, kind: output, shape index: {0}]   ;;  %s319_s6 = inlined_call_operand.hbm [shape: f32[8,128], index: 6, kind: output, shape index: {1}]  }
   0x1   :  { %v197_v0 = vld [vmem:[%s314_s1] sm:$0xff]  ;;  %v205_v2 = vld [vmem:[%s316_s3 + $0x38] sm:$0xff]  ;;  %v204_v4 = vld [vmem:[%s316_s3 + $0x30] sm:$0xff] }
   0x2   :  { %v24_v1 = vld [vmem:[%s313_s0] sm:$0xff]  ;;  %49 = vmatpush.bf16.msra.mxu0 %v197_v0  ;;  %126 = vmatpush.bf16.msra.mxu1 %v205_v2 }
   0x3   :  { %v25_v3 = vpack.c.bf16 %v24_v1, %v24_v1 }
   0x4   :  { %12 = vsyncpa [#allocation3], 0  ;;  %v203_v5 = vld [vmem:[%s316_s3 + $0x28] sm:$0xff]  ;;  %v202_v6 = vld [vmem:[%s316_s3 + $0x20] sm:$0xff]  ;;  %s235_s17 = smov [#allocation2]   ;;  %s149_s21 = sshll.u32 %s319_s6, 4  ;;  %s150_s21 = int_to_ptr.hbm [resolvable:$true] %s149_s21 }
   0x5   :  { %164 = vmatmul.msk.bf16.vlgmr.msra.gmra.mxu0 %vm38_vm0, %v25_v3  ;;  %v201_v7 = vld [vmem:[%s316_s3 + $0x18] sm:$0xff]  ;;  %v200_v8 = vld [vmem:[%s316_s3 + $0x10] sm:$0xff]  ;;  %v199_v9 = vld [vmem:[%s316_s3 + $0x8] sm:$0xff]  ;;  %s147_s18 = sshll.u32 %s235_s17, 4  ;;  %s148_s18 = int_to_ptr.vmem [resolvable:$true] %s147_s18 }
   0x6   :  { %127 = vmatpush.bf16.msra.mxu1 %v204_v4  ;;  %v198_v10 = vld [vmem:[%s316_s3] sm:$0xff] }
   0x7   :  { %v207_v11 = vld [vmem:[%s315_s2] ss:$0 sm:$0xff] }
   0x8   :  { %v208_v17 = vld [vmem:[%s317_s4] ss:$0 sm:$0xff] }
   0xa   :  { %128 = vmatpush.bf16.msra.mxu1 %v203_v5 }
   0xe   :  { %129 = vmatpush.bf16.msra.mxu1 %v202_v6 }
  0x12   :  { %130 = vmatpush.bf16.msra.mxu1 %v201_v7 }
  0x16   :  { %131 = vmatpush.bf16.msra.mxu1 %v200_v8 }
  0x1a   :  { %132 = vmatpush.bf16.msra.mxu1 %v199_v9 }
  0x1e   :  { %133 = vmatpush.bf16.msra.mxu1 %v198_v10 }
  0x82   :  { %v51_v12 = vpop.f32.mrf.mxu0 }
  0x83   :  { %v52_v13 = vadd.f32 %v207_v11, %v51_v12 }
  0x85   :  { %v55_v14 = vmax.f32 %v52_v13, 0.0 }
  0x87   :  { %56 = vst [vmem:[#allocation2] sm:$0xff] %v55_v14  ;;  %v57_v15 = vpack.c.bf16 %v55_v14, %v55_v14 }
  0x88   :  { %152 = dma.vmem_to_hbm [thread:$0]  %s148_s18, 128, %s150_s21, [#allocation3]  }
  0x89   :  { %134 = vmatmul.bf16.vlgmr.msra.gmra.mxu1 %v57_v15 }
  0x8a   :  { %v53_v16 = vpop.f32.mrf.mxu0 }
 0x106   :  { %v135_v18 = vpop.f32.mrf.mxu1 }
 0x107   :  { %v136_v19 = vadd.f32 %v208_v17, %v135_v18 }
 0x109   :  { %139 = vst [vmem:[%s318_s5] sm:$0xff] %v136_v19 }
 0x10e   :  { %v137_v20 = vpop.f32.mrf.mxu1 }
 0x10f   :  { %233 = dma.done.wait [#allocation3], 128  }
 0x110   :  { %234 = vsyncadd [#allocation3], 4294967168 }
 0x111   :  { %159 = vsyncpa [#allocation3], 1 }

</bundles_post_ra>
